<compile_context>
chip_gen: v7x
topology: tpu7x:2x2x1
jax: 0.10.0
libtpu: 0.0.40
codegen_flags: <defaults>
</compile_context>

<pallas_src>
from functools import partial  # noqa: F401  (kept for easy kernel parametrization)

import jax
import jax.numpy as jnp
from jax.experimental import pallas as pl
from jax.experimental.pallas import tpu as pltpu


def _round_up(x, m):
    return (x + m - 1) // m * m


def cnn_kernel(xcol_ref, w_ref, b2_ref, o_ref):
    # xcol_ref: (TB*Lp, CK) in-dtype (bf16/f32); CK lane-pads to 128 in VMEM
    # w_ref   : (CK, Ep)    in-dtype
    # b2_ref  : (Lp, Ep)    f32; rows >= Lout are pre-masked to -1e30
    # o_ref   : (TB, Ep)    f32; lane-dense (Ep % 128 == 0)
    Lp, Ep = b2_ref.shape
    TB = o_ref.shape[0]

    # One MXU matmul with contraction depth C*K, f32 accumulate.
    acc = jnp.dot(xcol_ref[...], w_ref[...], preferred_element_type=jnp.float32)

    # Tile-aligned split (Lp % 8 == 0, Ep % 128 == 0) + pre-masked bias + ReLU.
    acc = acc.reshape(TB, Lp, Ep) + b2_ref[...]
    acc = jnp.maximum(acc, 0.0)            # padded time rows -> exactly 0

    # Max over the (masked) time axis; lane-dense store.
    o_ref[...] = jnp.max(acc, axis=1).astype(o_ref.dtype)


def cnn_forward(x, w, b, *, block_b=None, use_bf16=True,
                vmem_budget_bytes=20 * 1024 * 1024):
    """x: (B, C, L) f32, w: (E, C, K) f32 (Conv1d layout), b: (E,) f32 -> (B, E) f32."""
    B, C, L = x.shape
    E, C2, K = w.shape
    assert C == C2
    Lout = L - K + 1
    assert Lout >= 1
    CK = C * K

    in_dtype = jnp.bfloat16 if use_bf16 else jnp.float32
    itemsize = jnp.dtype(in_dtype).itemsize
    sub = 16 if use_bf16 else 8            # sublane packing of the input dtype

    # Cast BEFORE im2col so the XLA im2col pass moves bf16, not f32.
    x = x.astype(in_dtype)
    w = w.astype(in_dtype)

    # ---- layout plumbing hoisted to XLA (one-time, amortized) ----
    # im2col: x_col[b, t, c*K + k] = x[b, c, t + k]
    taps = jnp.stack([x[:, :, k:k + Lout] for k in range(K)], axis=-1)   # (B, C, Lout, K)
    x_col = jnp.transpose(taps, (0, 2, 1, 3)).reshape(B, Lout, CK)       # (B, Lout, C*K)
    # weight: w_flat[c*K + k, e] = w[e, c, k]
    w_flat = jnp.transpose(w, (1, 2, 0)).reshape(CK, E)

    # Padding for tile alignment / lane-dense output.
    Lp = _round_up(Lout, sub)
    Ep = _round_up(E, 128)

    # ---- batch-tile selection from a VMEM budget ----
    # Per batch-row VMEM bytes:
    #   2 double-buffered xcol rows (CK lane-pads to 128) + f32 accumulator row
    #   + 2 double-buffered output rows.
    bytes_per_row = 2 * Lp * 128 * itemsize + Lp * Ep * 4 + 2 * Ep * 4
    if block_b is None:
        tb_vmem = max(sub, vmem_budget_bytes // bytes_per_row)
        tb_split = _round_up(max(1, pl.cdiv(B, 2)), sub)   # >= 2 grid steps when B allows
        block_b = min(1024, tb_vmem, tb_split)
    TB = max(sub, (block_b // sub) * sub)
    Bp = _round_up(B, TB)

    x_col = jnp.pad(x_col, ((0, Bp - B), (0, Lp - Lout), (0, 0)))
    x_col = x_col.reshape(Bp * Lp, CK)     # pre-flattened: matmul LHS is the raw block
    w_flat = jnp.pad(w_flat, ((0, 0), (0, Ep - E)))

    # Pre-masked bias: padded time rows get -1e30 so ReLU clamps them to 0
    # (valid since ReLU output >= 0, max unchanged).
    b_pad = jnp.pad(b.astype(jnp.float32), (0, Ep - E))
    valid_row = (jnp.arange(Lp) < Lout)[:, None]
    b2 = jnp.where(valid_row, b_pad[None, :], jnp.float32(-1e30))        # (Lp, Ep) f32

    cost = pl.CostEstimate(
        flops=2 * Bp * Lp * CK * Ep,
        transcendentals=0,
        bytes_accessed=(x_col.size * x_col.dtype.itemsize
                        + w_flat.size * w_flat.dtype.itemsize
                        + b2.size * 4
                        + Bp * Ep * 4),
    )

    out = pl.pallas_call(
        cnn_kernel,
        out_shape=jax.ShapeDtypeStruct((Bp, Ep), jnp.float32),
        grid_spec=pltpu.PrefetchScalarGridSpec(
            num_scalar_prefetch=0,
            grid=(Bp // TB,),
            in_specs=[
                pl.BlockSpec((TB * Lp, CK), lambda i: (i, 0)),
                pl.BlockSpec((CK, Ep), lambda i: (0, 0)),
                pl.BlockSpec((Lp, Ep), lambda i: (0, 0)),
            ],
            out_specs=pl.BlockSpec((TB, Ep), lambda i: (i, 0)),
        ),
        compiler_params=pltpu.CompilerParams(
            dimension_semantics=("parallel",),
            vmem_limit_bytes=32 * 1024 * 1024),
        cost_estimate=cost,
    )(x_col, w_flat, b2)

    return out[:B, :E]


def cnn_reference(x, w, b):
    """Pure-JAX reference (matches torch Conv1d VALID + relu + max over last dim)."""
    conv = jax.lax.conv_general_dilated(
        x, w, window_strides=(1,), padding="VALID",
        dimension_numbers=("NCH", "OIH", "NCH"))
    conv = conv + b[None, :, None]
    return jnp.max(jax.nn.relu(conv), axis=-1)


if __name__ == "__main__":
    # Small shapes consistent with the module's forward.
    char_embed_size = 4      # C
    word_embed_size = 32     # E
    kernel_size = 5          # K
    max_word_len = 16        # L
    batch = 16               # B (sentence_len * batch flattened in the assignment)

    key = jax.random.PRNGKey(0)
    kx, kw, kb = jax.random.split(key, 3)

    x = jax.random.normal(kx, (batch, char_embed_size, max_word_len), dtype=jnp.float32)
    # Deterministic parameter init (synthetic; not a checkpoint load).
    w = 0.1 * jax.random.normal(
        kw, (word_embed_size, char_embed_size, kernel_size), dtype=jnp.float32)
    b = 0.1 * jax.random.normal(kb, (word_embed_size,), dtype=jnp.float32)

    out = jax.block_until_ready(cnn_forward(x, w, b))
    ref = cnn_reference(x, w, b)
    assert out.shape == (batch, word_embed_size)
    # bf16 matmul inputs (f32 accumulation + f32 epilogue) -> loosened tolerance.
    assert jnp.allclose(out, ref, atol=2e-2, rtol=2e-2), "mismatch vs reference"

    print("KERNEL_OK")
</pallas_src>

<mosaic_0001>
module attributes {stable_mosaic.version = 11 : i64} {
  func.func @cnn_kernel(%arg0: i32, %arg1: memref<256x20xbf16, #tpu.memory_space<vmem>>, %arg2: memref<20x128xbf16, #tpu.memory_space<vmem>>, %arg3: memref<16x128xf32, #tpu.memory_space<vmem>>, %arg4: memref<16x128xf32, #tpu.memory_space<vmem>>) attributes {dimension_semantics = [#tpu.dimension_semantics<parallel>], iteration_bounds = array<i64: 1>, scalar_prefetch = 0 : i64, scratch_operands = 0 : i64, tpu.core_type = #tpu.core_type<tc>, window_params = [{transform_indices = @transform_0, window_bounds = array<i64: 256, 20>}, {pipeline_mode = #tpu.pipeline_mode<synchronous>, transform_indices = @transform_1, window_bounds = array<i64: 20, 128>}, {pipeline_mode = #tpu.pipeline_mode<synchronous>, transform_indices = @transform_2, window_bounds = array<i64: 16, 128>}, {transform_indices = @transform_3, window_bounds = array<i64: 16, 128>}]} {
    %c0 = arith.constant 0 : index
    %c0_0 = arith.constant 0 : index
    %0 = vector.load %arg1[%c0, %c0_0] : memref<256x20xbf16, #tpu.memory_space<vmem>>, vector<256x20xbf16>
    %c0_1 = arith.constant 0 : index
    %c0_2 = arith.constant 0 : index
    %1 = vector.load %arg2[%c0_1, %c0_2] : memref<20x128xbf16, #tpu.memory_space<vmem>>, vector<20x128xbf16>
    %cst = arith.constant dense<0.000000e+00> : vector<256x128xf32>
    %2 = tpu.matmul %0, %1, %cst {dimension_numbers = #tpu.dot_dimension_numbers<[1], [0], [0], [1], [0, 0, 1, 1], [], []>} : vector<256x20xbf16>, vector<20x128xbf16>, vector<256x128xf32> -> vector<256x128xf32>
    %3 = vector.shape_cast %2 : vector<256x128xf32> to vector<16x16x128xf32>
    %c0_3 = arith.constant 0 : index
    %c0_4 = arith.constant 0 : index
    %4 = vector.load %arg3[%c0_3, %c0_4] : memref<16x128xf32, #tpu.memory_space<vmem>>, vector<16x128xf32>
    %5 = vector.shape_cast %4 : vector<16x128xf32> to vector<1x16x128xf32>
    %6 = vector.broadcast %5 : vector<1x16x128xf32> to vector<16x16x128xf32>
    %7 = arith.addf %3, %6 : vector<16x16x128xf32>
    %cst_5 = arith.constant 0.000000e+00 : f32
    %8 = vector.broadcast %cst_5 : f32 to vector<16x16x128xf32>
    %9 = arith.maximumf %7, %8 : vector<16x16x128xf32>
    %cst_6 = arith.constant dense<0xFF800000> : vector<16x128xf32>
    %10 = vector.multi_reduction <maximumf>, %9, %cst_6 [1] : vector<16x16x128xf32> to vector<16x128xf32>
    %c0_7 = arith.constant 0 : index
    %c0_8 = arith.constant 0 : index
    %11 = vector.load %arg4[%c0_7, %c0_8] : memref<16x128xf32, #tpu.memory_space<vmem>>, vector<16x128xf32>
    tpu.vector_store %arg4[%c0_7, %c0_8], %10 {strides = array<i32>} : memref<16x128xf32, #tpu.memory_space<vmem>>, vector<16x128xf32>,
    return
  }
  func.func @transform_0(%arg0: i32) -> (i32, i32) {
    %c0_i32 = arith.constant 0 : i32
    %c0_i32_0 = arith.constant 0 : i32
    return %arg0, %c0_i32 : i32, i32
  }
  func.func @transform_1(%arg0: i32) -> (i32, i32) {
    %c0_i32 = arith.constant 0 : i32
    %c0_i32_0 = arith.constant 0 : i32
    %c0_i32_1 = arith.constant 0 : i32
    return %c0_i32, %c0_i32_0 : i32, i32
  }
  func.func @transform_2(%arg0: i32) -> (i32, i32) {
    %c0_i32 = arith.constant 0 : i32
    %c0_i32_0 = arith.constant 0 : i32
    %c0_i32_1 = arith.constant 0 : i32
    return %c0_i32, %c0_i32_0 : i32, i32
  }
  func.func @transform_3(%arg0: i32) -> (i32, i32) {
    %c0_i32 = arith.constant 0 : i32
    %c0_i32_0 = arith.constant 0 : i32
    return %arg0, %c0_i32 : i32, i32
  }
}

</mosaic_0001>

<bundles_post_ra>
// kernel: tpu_custom_call.1
= control target key start
LH: loop header
LB: loop body
LE: loop exit
PB: predicated region body
PF: predicated region fallthrough
CT: control target
= control target key end

     0   :  { %vm189_vm0 = vcmask 1041408   ;;  %vm140_vm1 = vcmask 162816   ;;  %s883_s0 = inlined_call_operand.vmem [shape: bf16[256,20], index: 0, kind: input, shape index: {}]   ;;  %s884_s1 = inlined_call_operand.vmem [shape: bf16[20,128], index: 1, kind: input, shape index: {}]   ;;  %s885_s2 = inlined_call_operand.vmem [shape: f32[16,128], index: 2, kind: input, shape index: {}]   ;;  %s886_s3 = inlined_call_operand.hbm [shape: f32[16,128], index: 3, kind: output, shape index: {}]  }
   0x1   :  { %v686_v0 = vld [vmem:[%s884_s1] sm:$0xff]   ;;  %v687_v1 = vld [vmem:[%s884_s1 + $0x8] ss:$0 sps:$4 sm:$0x33]   ;;  %v692_v7 = vld [vmem:[%s883_s0 + $0x10] sm:$0xff]  }
   0x2   :  { %v688_v2 = vld [vmem:[%s883_s0] sm:$0xff]   ;;  %641 = vmatprep.subr.bf16.mxu0 %v686_v0  ;;  %677 = vmatprep.subr.bf16.mxu1 %v686_v0  ;;  %v191_v4 = vsel %vm189_vm0, %v687_v1, 0  ;;  %v690_v5 = vld [vmem:[%s883_s0 + $0x8] sm:$0xff]   ;;  %v693_v8 = vld [vmem:[%s883_s0 + $0x50] sm:$0xff]  }
   0x3   :  { %v689_v3 = vld [vmem:[%s883_s0 + $0x40] sm:$0xff]   ;;  %642 = vmatpush3.bf16.msra.mxu0 %v686_v0  ;;  %679 = vmatpush3.bf16.msra.mxu1 %v686_v0  ;;  %v691_v6 = vld [vmem:[%s883_s0 + $0x48] sm:$0xff]   ;;  %v694_v9 = vld [vmem:[%s883_s0 + $0x18] sm:$0xff]  }
   0x4   :  { %681 = vmatprep.subr.msk.bf16.mxu0 %vm189_vm0, %v687_v1  ;;  %682 = vmatprep.subr.msk.bf16.mxu1 %vm189_vm0, %v687_v1  ;;  %v695_v10 = vld [vmem:[%s883_s0 + $0x58] sm:$0xff]   ;;  %v696_v11 = vld [vmem:[%s883_s0 + $0x20] sm:$0xff]  }
   0x5   :  { %645 = vmatprep.mubr.msk.bf16.mxu0 %vm140_vm1, %v688_v2  ;;  %661 = vmatprep.mubr.msk.bf16.mxu1 %vm140_vm1, %v689_v3  ;;  %v697_v12 = vld [vmem:[%s883_s0 + $0x60] sm:$0xff]  }
   0x7   :  { %644 = vmatpush3.bf16.msra.mxu0 %v191_v4  ;;  %680 = vmatpush3.bf16.msra.mxu1 %v191_v4 }
   0xa   :  { %646 = vmatmul.mubr.msk.bf16.vlgmr.msra.gmra.mrb[0].mxu0 %vm140_vm1, %v690_v5  ;;  %662 = vmatmul.mubr.msk.bf16.vlgmr.msra.gmra.mrb[0].mxu1 %vm140_vm1, %v691_v6 }
   0xb   :  { %649 = vmatprep.mubr.msk.bf16.mxu0 %vm140_vm1, %v692_v7  ;;  %665 = vmatprep.mubr.msk.bf16.mxu1 %vm140_vm1, %v693_v8 }
   0xc   :  { %8 = vsyncpa [#allocation3], 0  ;;  %v698_v13 = vld [vmem:[%s883_s0 + $0x28] sm:$0xff]   ;;  %v700_v15 = vld [vmem:[%s883_s0 + $0x30] sm:$0xff]   ;;  %vm548_vm2 = vcmask 1041409   ;;  %vm550_vm3 = vcmask 1042434  }
   0xd   :  { %v699_v14 = vld [vmem:[%s883_s0 + $0x68] sm:$0xff]   ;;  %v701_v16 = vld [vmem:[%s883_s0 + $0x70] sm:$0xff]   ;;  %v702_v17 = vld [vmem:[%s883_s0 + $0x38] sm:$0xff]   ;;  %vm552_vm4 = vcmask 1043459   ;;  %vm554_vm5 = vcmask 1044484   ;;  %vm556_vm6 = vcmask 1045509  }
   0xe   :  { %v703_v18 = vld [vmem:[%s883_s0 + $0x78] sm:$0xff]   ;;  %v824_v19 = vld [vmem:[%s885_s2] sm:$0xff]  ;;  %v829_v22 = vld [vmem:[%s885_s2 + $0x8] sm:$0xff]  ;;  %s728_s0 = smov [#allocation2]   ;;  %vm558_vm7 = vcmask 1046534   ;;  %vm560_vm8 = vcmask 1047559  }
   0xf   :  { %s578_s2 = sshll.u32 %s728_s0, 4  ;;  %s579_s2 = int_to_ptr.vmem [resolvable:$true] %s578_s2 }
  0x10   :  { %s704_s23 = scalar_lea.vmem %s579_s2, 256  ;;  %p709_p1 = scmp.lt.s32.totalorder %s579_s2, %s579_s2 }
  0x11   :  { %p705_p0 = scmp.ne.s32.totalorder %s579_s2, %s704_s23  ;;  %p710_p2 = scmp.lt.s32.totalorder %s704_s23, %s704_s23 }
  0x12   :  { %650 = vmatmul.mubr.msk.bf16.gmra.mrb[4].mxu0 %vm140_vm1, %v694_v9  ;;  %666 = vmatmul.mubr.msk.bf16.gmra.mrb[4].mxu1 %vm140_vm1, %v695_v10 }
  0x13   :  { %653 = vmatprep.mubr.msk.bf16.mxu0 %vm140_vm1, %v696_v11  ;;  %669 = vmatprep.mubr.msk.bf16.mxu1 %vm140_vm1, %v697_v12  ;;  %p711_p3 = por %p710_p2, %p709_p1 }
  0x15   :  { %p712_p4 = pnand %p711_p3, %p705_p0 }
  0x1a   :  { %654 = vmatmul.mubr.msk.bf16.gmra.mrb[8].mxu0 %vm140_vm1, %v698_v13  ;;  %670 = vmatmul.mubr.msk.bf16.gmra.mrb[8].mxu1 %vm140_vm1, %v699_v14 }
  0x1b   :  { %657 = vmatprep.mubr.msk.bf16.mxu0 %vm140_vm1, %v700_v15  ;;  %673 = vmatprep.mubr.msk.bf16.mxu1 %vm140_vm1, %v701_v16 }
  0x22   :  { %658 = vmatmul.mubr.msk.bf16.gmra.mrb[12].mxu0 %vm140_vm1, %v702_v17  ;;  %674 = vmatmul.mubr.msk.bf16.gmra.mrb[12].mxu1 %vm140_vm1, %v703_v18 }
  0xdd   :  { %v647_v20 = vpop.f32.mrb[0].mxu0  ;;  %v663_v21 = vpop.f32.mrb[0].mxu1 }
  0xde   :  { %v358_v23 = vadd.f32 %v647_v20, %v824_v19  ;;  %v374_v24 = vadd.f32 %v663_v21, %v824_v19  ;;  %v227_v25 = vpop.f32.mrb[1].mxu0  ;;  %v291_v26 = vpop.f32.mrb[1].mxu1 }
  0xdf   :  { %v356_v27 = vadd.f32 %v824_v19, %v227_v25  ;;  %v372_v28 = vadd.f32 %v824_v19, %v291_v26  ;;  %v648_v29 = vpop.f32.mrb[2].mxu0  ;;  %v664_v30 = vpop.f32.mrb[2].mxu1 }
  0xe0   :  { %v359_v31 = vadd.f32 %v648_v29, %v829_v22  ;;  %v375_v32 = vadd.f32 %v664_v30, %v829_v22  ;;  %v230_v33 = vpop.f32.mrb[3].mxu0  ;;  %v294_v34 = vpop.f32.mrb[3].mxu1  ;;  %v390_v37 = vmax.f32 %v358_v23, 0.0  ;;  %v406_v38 = vmax.f32 %v374_v24, 0.0 }
  0xe1   :  { %v357_v35 = vadd.f32 %v829_v22, %v230_v33  ;;  %v373_v36 = vadd.f32 %v829_v22, %v294_v34  ;;  %v388_v41 = vmax.f32 %v356_v27, 0.0  ;;  %v404_v42 = vmax.f32 %v372_v28, 0.0 }
  0xe2   :  { %v391_v39 = vmax.f32 %v359_v31, 0.0  ;;  %v407_v40 = vmax.f32 %v375_v32, 0.0 }
  0xe3   :  { %v389_v43 = vmax.f32 %v357_v35, 0.0  ;;  %v405_v44 = vmax.f32 %v373_v36, 0.0 }
  0xe4   :  { %v427_v45 = vmax.f32 %v390_v37, %v391_v39  ;;  %v483_v46 = vmax.f32 %v406_v38, %v407_v40 }
  0xe5   :  { %v420_v47 = vmax.f32 %v388_v41, %v389_v43  ;;  %v476_v48 = vmax.f32 %v404_v42, %v405_v44  ;;  %v651_v49 = vpop.f32.mrb[4].mxu0  ;;  %v667_v50 = vpop.f32.mrb[4].mxu1 }
  0xe6   :  { %v428_v51 = vrot.slane %v427_v45, 4  ;;  %v484_v52 = vrot.slane %v483_v46, 4  ;;  %v362_v53 = vadd.f32 %v651_v49, %v824_v19  ;;  %v378_v54 = vadd.f32 %v667_v50, %v824_v19  ;;  %v243_v55 = vpop.f32.mrb[5].mxu0  ;;  %v307_v56 = vpop.f32.mrb[5].mxu1 }
  0xe7   :  { %v421_v57 = vrot.slane %v420_v47, 4  ;;  %v477_v58 = vrot.slane %v476_v48, 4  ;;  %v360_v59 = vadd.f32 %v824_v19, %v243_v55  ;;  %v376_v60 = vadd.f32 %v824_v19, %v307_v56  ;;  %v652_v61 = vpop.f32.mrb[6].mxu0  ;;  %v668_v62 = vpop.f32.mrb[6].mxu1 }
  0xe8   :  { %v429_v63 = vmax.f32 %v427_v45, %v428_v51  ;;  %v485_v0 = vmax.f32 %v483_v46, %v484_v52  ;;  %v394_v1 = vmax.f32 %v362_v53, 0.0  ;;  %v410_v2 = vmax.f32 %v378_v54, 0.0  ;;  %v246_v3 = vpop.f32.mrb[7].mxu0  ;;  %v310_v4 = vpop.f32.mrb[7].mxu1 }
  0xe9   :  { %v422_v5 = vmax.f32 %v420_v47, %v421_v57  ;;  %v478_v6 = vmax.f32 %v476_v48, %v477_v58  ;;  %v392_v7 = vmax.f32 %v360_v59, 0.0  ;;  %v408_v8 = vmax.f32 %v376_v60, 0.0 }
  0xea   :  { %v430_v9 = vrot.slane %v429_v63, 2  ;;  %v486_v10 = vrot.slane %v485_v0, 2  ;;  %v363_v11 = vadd.f32 %v652_v61, %v829_v22  ;;  %v379_v12 = vadd.f32 %v668_v62, %v829_v22 }
  0xeb   :  { %v423_v13 = vrot.slane %v422_v5, 2  ;;  %v479_v14 = vrot.slane %v478_v6, 2  ;;  %v361_v15 = vadd.f32 %v829_v22, %v246_v3  ;;  %v377_v16 = vadd.f32 %v829_v22, %v310_v4 }
  0xec   :  { %v431_v17 = vmax.f32 %v429_v63, %v430_v9  ;;  %v487_v18 = vmax.f32 %v485_v0, %v486_v10  ;;  %v395_v20 = vmax.f32 %v363_v11, 0.0  ;;  %v411_v21 = vmax.f32 %v379_v12, 0.0 }
  0xed   :  { %v424_v23 = vmax.f32 %v422_v5, %v423_v13  ;;  %v480_v24 = vmax.f32 %v478_v6, %v479_v14  ;;  %v393_v25 = vmax.f32 %v361_v15, 0.0  ;;  %v409_v26 = vmax.f32 %v377_v16, 0.0  ;;  %v655_v27 = vpop.f32.mrb[8].mxu0  ;;  %v671_v28 = vpop.f32.mrb[8].mxu1 }
  0xee   :  { %v432_v29 = vrot.slane %v431_v17, 1  ;;  %v488_v30 = vrot.slane %v487_v18, 1  ;;  %v441_v31 = vmax.f32 %v394_v1, %v395_v20  ;;  %v497_v32 = vmax.f32 %v410_v2, %v411_v21  ;;  %v259_v33 = vpop.f32.mrb[9].mxu0  ;;  %v323_v34 = vpop.f32.mrb[9].mxu1 }
  0xef   :  { %v425_v35 = vrot.slane %v424_v23, 1  ;;  %v481_v36 = vrot.slane %v480_v24, 1  ;;  %v434_v37 = vmax.f32 %v392_v7, %v393_v25  ;;  %v490_v38 = vmax.f32 %v408_v8, %v409_v26  ;;  %v656_v39 = vpop.f32.mrb[10].mxu0  ;;  %v672_v40 = vpop.f32.mrb[10].mxu1 }
  0xf0   :  { %v433_v41 = vmax.f32 %v431_v17, %v432_v29  ;;  %v489_v42 = vmax.f32 %v487_v18, %v488_v30  ;;  %v442_v43 = vrot.slane %v441_v31, 4  ;;  %v498_v44 = vrot.slane %v497_v32, 4  ;;  %v262_v45 = vpop.f32.mrb[11].mxu0  ;;  %v326_v46 = vpop.f32.mrb[11].mxu1 }
  0xf1   :  { %v426_v47 = vmax.f32 %v424_v23, %v425_v35  ;;  %v482_v48 = vmax.f32 %v480_v24, %v481_v36  ;;  %v435_v49 = vrot.slane %v434_v37, 4  ;;  %v491_v50 = vrot.slane %v490_v38, 4 }
  0xf2   :  { %v443_v51 = vmax.f32 %v441_v31, %v442_v43  ;;  %v499_v52 = vmax.f32 %v497_v32, %v498_v44  ;;  %v366_v53 = vadd.f32 %v655_v27, %v824_v19  ;;  %v382_v54 = vadd.f32 %v671_v28, %v824_v19 }
  0xf3   :  { %v549_v55 = vsel %vm548_vm2, %v433_v41, %v426_v47  ;;  %v562_v56 = vsel %vm548_vm2, %v489_v42, %v482_v48  ;;  %v436_v57 = vmax.f32 %v434_v37, %v435_v49  ;;  %v492_v58 = vmax.f32 %v490_v38, %v491_v50 }
  0xf4   :  { %v444_v59 = vrot.slane %v443_v51, 2  ;;  %v500_v60 = vrot.slane %v499_v52, 2  ;;  %v398_v61 = vmax.f32 %v366_v53, 0.0  ;;  %v414_v62 = vmax.f32 %v382_v54, 0.0 }
  0xf5   :  { %v437_v63 = vrot.slane %v436_v57, 2  ;;  %v493_v0 = vrot.slane %v492_v58, 2  ;;  %v364_v1 = vadd.f32 %v824_v19, %v259_v33  ;;  %v380_v2 = vadd.f32 %v824_v19, %v323_v34  ;;  %v659_v3 = vpop.f32.mrb[12].mxu0  ;;  %v675_v4 = vpop.f32.mrb[12].mxu1 }
  0xf6   :  { %v445_v5 = vmax.f32 %v443_v51, %v444_v59  ;;  %v501_v6 = vmax.f32 %v499_v52, %v500_v60  ;;  %v367_v7 = vadd.f32 %v656_v39, %v829_v22  ;;  %v383_v8 = vadd.f32 %v672_v40, %v829_v22  ;;  %v275_v9 = vpop.f32.mrb[13].mxu0  ;;  %v339_v10 = vpop.f32.mrb[13].mxu1 }
  0xf7   :  { %v438_v11 = vmax.f32 %v436_v57, %v437_v63  ;;  %v494_v12 = vmax.f32 %v492_v58, %v493_v0  ;;  %v396_v13 = vmax.f32 %v364_v1, 0.0  ;;  %v412_v14 = vmax.f32 %v380_v2, 0.0  ;;  %v660_v15 = vpop.f32.mrb[14].mxu0  ;;  %v676_v16 = vpop.f32.mrb[14].mxu1 }
  0xf8   :  { %v446_v17 = vrot.slane %v445_v5, 1  ;;  %v502_v18 = vrot.slane %v501_v6, 1  ;;  %v399_v20 = vmax.f32 %v367_v7, 0.0  ;;  %v415_v21 = vmax.f32 %v383_v8, 0.0  ;;  %v278_v23 = vpop.f32.mrb[15].mxu0  ;;  %v342_v24 = vpop.f32.mrb[15].mxu1 }
  0xf9   :  { %v439_v25 = vrot.slane %v438_v11, 1  ;;  %v495_v26 = vrot.slane %v494_v12, 1  ;;  %v365_v27 = vadd.f32 %v829_v22, %v262_v45  ;;  %v381_v28 = vadd.f32 %v829_v22, %v326_v46 }
  0xfa   :  { %v447_v29 = vmax.f32 %v445_v5, %v446_v17  ;;  %v503_v30 = vmax.f32 %v501_v6, %v502_v18  ;;  %v455_v31 = vmax.f32 %v398_v61, %v399_v20  ;;  %v511_v32 = vmax.f32 %v414_v62, %v415_v21 }
  0xfb   :  { %v440_v33 = vmax.f32 %v438_v11, %v439_v25  ;;  %v496_v34 = vmax.f32 %v494_v12, %v495_v26  ;;  %v397_v35 = vmax.f32 %v365_v27, 0.0  ;;  %v413_v36 = vmax.f32 %v381_v28, 0.0 }
  0xfc   :  { %v456_v37 = vrot.slane %v455_v31, 4  ;;  %v512_v38 = vrot.slane %v511_v32, 4  ;;  %v370_v39 = vadd.f32 %v659_v3, %v824_v19  ;;  %v386_v40 = vadd.f32 %v675_v4, %v824_v19 }
  0xfd   :  { %v551_v41 = vsel %vm550_vm3, %v440_v33, %v549_v55  ;;  %v563_v42 = vsel %vm550_vm3, %v496_v34, %v562_v56  ;;  %v448_v43 = vmax.f32 %v396_v13, %v397_v35  ;;  %v504_v44 = vmax.f32 %v412_v14, %v413_v36 }
  0xfe   :  { %v457_v45 = vmax.f32 %v455_v31, %v456_v37  ;;  %v513_v46 = vmax.f32 %v511_v32, %v512_v38  ;;  %v553_v47 = vsel %vm552_vm4, %v447_v29, %v551_v41  ;;  %v564_v48 = vsel %vm552_vm4, %v503_v30, %v563_v42 }
  0xff   :  { %v449_v49 = vrot.slane %v448_v43, 4  ;;  %v505_v50 = vrot.slane %v504_v44, 4  ;;  %v368_v53 = vadd.f32 %v824_v19, %v275_v9  ;;  %v384_v54 = vadd.f32 %v824_v19, %v339_v10 }
 0x100   :  { %v458_v51 = vrot.slane %v457_v45, 2  ;;  %v514_v52 = vrot.slane %v513_v46, 2  ;;  %v371_v56 = vadd.f32 %v660_v15, %v829_v22  ;;  %v387_v58 = vadd.f32 %v676_v16, %v829_v22 }
 0x101   :  { %v450_v57 = vmax.f32 %v448_v43, %v449_v49  ;;  %v506_v55 = vmax.f32 %v504_v44, %v505_v50  ;;  %v402_v61 = vmax.f32 %v370_v39, 0.0  ;;  %v418_v62 = vmax.f32 %v386_v40, 0.0 }
 0x102   :  { %v459_v59 = vmax.f32 %v457_v45, %v458_v51  ;;  %v515_v60 = vmax.f32 %v513_v46, %v514_v52  ;;  %v403_v1 = vmax.f32 %v371_v56, 0.0  ;;  %v419_v2 = vmax.f32 %v387_v58, 0.0 }
 0x103   :  { %v451_v63 = vrot.slane %v450_v57, 2  ;;  %v507_v0 = vrot.slane %v506_v55, 2  ;;  %v400_v3 = vmax.f32 %v368_v53, 0.0  ;;  %v416_v4 = vmax.f32 %v384_v54, 0.0 }
 0x104   :  { %v369_v5 = vadd.f32 %v829_v22, %v278_v23  ;;  %v385_v19 = vadd.f32 %v829_v22, %v342_v24  ;;  %v469_v8 = vmax.f32 %v402_v61, %v403_v1  ;;  %v525_v9 = vmax.f32 %v418_v62, %v419_v2 }
 0x105   :  { %v452_v6 = vmax.f32 %v450_v57, %v451_v63  ;;  %v508_v7 = vmax.f32 %v506_v55, %v507_v0  ;;  %v460_v10 = vrot.slane %v459_v59, 1  ;;  %v516_v11 = vrot.slane %v515_v60, 1 }
 0x106   :  { %v401_v12 = vmax.f32 %v369_v5, 0.0  ;;  %v417_v13 = vmax.f32 %v385_v19, 0.0  ;;  %v470_v16 = vrot.slane %v469_v8, 4  ;;  %v526_v17 = vrot.slane %v525_v9, 4 }
 0x107   :  { %v453_v14 = vrot.slane %v452_v6, 1  ;;  %v509_v15 = vrot.slane %v508_v7, 1  ;;  %v461_v24 = vmax.f32 %v459_v59, %v460_v10  ;;  %v517_v26 = vmax.f32 %v515_v60, %v516_v11 }
 0x108   :  { %v462_v18 = vmax.f32 %v400_v3, %v401_v12  ;;  %v518_v20 = vmax.f32 %v416_v4, %v417_v13  ;;  %v471_v25 = vmax.f32 %v469_v8, %v470_v16  ;;  %v527_v22 = vmax.f32 %v525_v9, %v526_v17 }
 0x109   :  { %v454_v21 = vmax.f32 %v452_v6, %v453_v14  ;;  %v510_v23 = vmax.f32 %v508_v7, %v509_v15 }
 0x10a   :  { %v463_v27 = vrot.slane %v462_v18, 4  ;;  %v519_v28 = vrot.slane %v518_v20, 4  ;;  %v472_v31 = vrot.slane %v471_v25, 2  ;;  %v528_v32 = vrot.slane %v527_v22, 2 }
 0x10b   :  { %v555_v29 = vsel %vm554_vm5, %v454_v21, %v553_v47  ;;  %v565_v30 = vsel %vm554_vm5, %v510_v23, %v564_v48 }
 0x10c   :  { %v464_v33 = vmax.f32 %v462_v18, %v463_v27  ;;  %v520_v34 = vmax.f32 %v518_v20, %v519_v28  ;;  %v557_v35 = vsel %vm556_vm6, %v461_v24, %v555_v29  ;;  %v566_v36 = vsel %vm556_vm6, %v517_v26, %v565_v30 }
 0x10d   :  { %v473_v37 = vmax.f32 %v471_v25, %v472_v31  ;;  %v529_v38 = vmax.f32 %v527_v22, %v528_v32 }
 0x10e   :  { %v465_v39 = vrot.slane %v464_v33, 2  ;;  %v521_v40 = vrot.slane %v520_v34, 2 }
 0x10f   :  { %v474_v43 = vrot.slane %v473_v37, 1  ;;  %v530_v44 = vrot.slane %v529_v38, 1 }
 0x110   :  { %v466_v41 = vmax.f32 %v464_v33, %v465_v39  ;;  %v522_v42 = vmax.f32 %v520_v34, %v521_v40 }
 0x111   :  { %v475_v49 = vmax.f32 %v473_v37, %v474_v43  ;;  %v531_v50 = vmax.f32 %v529_v38, %v530_v44 }
 0x112   :  { %v467_v45 = vrot.slane %v466_v41, 1  ;;  %v523_v46 = vrot.slane %v522_v42, 1 }
 0x114   :  { %v468_v47 = vmax.f32 %v466_v41, %v467_v45  ;;  %v524_v48 = vmax.f32 %v522_v42, %v523_v46 }
 0x116   :  { %v559_v51 = vsel %vm558_vm7, %v468_v47, %v557_v35  ;;  %v567_v52 = vsel %vm558_vm7, %v524_v48, %v566_v36 }
 0x117   :  { %v561_v53 = vsel %vm560_vm8, %v475_v49, %v559_v51  ;;  %v568_v54 = vsel %vm560_vm8, %v531_v50, %v567_v52 }
 0x118   :  { %571 = vst [vmem:[#allocation2] sm:$0xff] %v561_v53  ;;  %572 = vst [vmem:[#allocation2 + $0x8] sm:$0xff] %v568_v54 }
 0x119   :  { %715 = shalt.err (!%p712_p4)
}
 0x11a   :  { %s716_s26 = scalar_lea.hbm %s886_s3, 256 }
 0x11b   :  { %p717_p5 = scmp.ne.s32.totalorder %s886_s3, %s716_s26  ;;  %p720_p6 = scmp.lt.u32.totalorder %s716_s26, %s886_s3 }
 0x11d   :  { %p722_p7 = pnand %p720_p6, %p717_p5 }
 0x11f   :  { %725 = shalt.err (!%p722_p7)
}
 0x120   :  { %s729_s4 = smov 128   ;;  %s730_s5 = smov 8  }
 0x121   :  { %584 = dma.vmem_to_hbm [thread:$0]  %s579_s2, 256, %s886_s3, [#allocation3], %s729_s4, %s729_s4, %s730_s5  }
 0x122   :  { %726 = dma.done.wait [#allocation3], 256  }
 0x123   :  { %727 = vsyncadd [#allocation3], 4294967040 }
 0x124   :  { %588 = vsyncpa [#allocation3], 1 }

</bundles_post_ra>
